<compile_context>
chip_gen: v6e
topology: v6e:2x2x1
jax: 0.10.0
libtpu: 0.0.40
codegen_flags: <defaults>
</compile_context>

<pallas_src>
import functools
import math

import jax
import jax.numpy as jnp
from jax.experimental import pallas as pl
from jax.experimental.pallas import tpu as pltpu

_LANES = 128
_SUBLANES = 8


def _round_up(n, m):
    return ((n + m - 1) // m) * m


def _cdiv(a, b):
    return -(-a // b)


def pinn_kernel(p_ref, x_ref, o_ref, *, hidden):
    # p_ref: (4*hidden + 1,) f32 in SMEM, packed as [w1_x | w1_t | b1 | w2 | b2]
    # x_ref: (2, tile_rows, 128) VMEM  -- feature-major, batch dense on (sublane, lane)
    # o_ref: (tile_rows, 128)
    x0 = x_ref[0]                                    # (tile_rows, 128)
    x1 = x_ref[1]                                    # (tile_rows, 128)

    acc = jnp.zeros(x0.shape, dtype=jnp.float32)
    # Unrolled loop over exactly `hidden` units: scalar params from SMEM, FMAs on the
    # VPU, tanh on the EUP, accumulation in f32.  No padded hidden rows, no reduce.
    for j in range(hidden):
        w1x = p_ref[j]
        w1t = p_ref[hidden + j]
        b1j = p_ref[2 * hidden + j]
        w2j = p_ref[3 * hidden + j]
        acc = acc + w2j * jnp.tanh(w1x * x0 + w1t * x1 + b1j)

    b2 = p_ref[4 * hidden]
    o_ref[...] = (acc + b2).astype(o_ref.dtype)      # full-vreg unmasked store


def pack_params(w1, b1, w2, b2):
    """Flatten all parameters into one 1-D f32 array: [w1_x | w1_t | b1 | w2 | b2]."""
    return jnp.concatenate([
        w1[0, :].astype(jnp.float32),
        w1[1, :].astype(jnp.float32),
        jnp.reshape(b1, (-1,)).astype(jnp.float32),
        jnp.reshape(w2, (-1,)).astype(jnp.float32),
        jnp.reshape(b2, (-1,)).astype(jnp.float32),
    ])


def pack_inputs(x, tile_rows):
    """(N, 2) -> (2, rows_total, 128) feature-major, batch dense on sublanes+lanes.

    Padded points are zero and are sliced off after the kernel.  In a PINN training
    loop, cache this packed layout of the collocation points across steps.
    """
    n = x.shape[0]
    n_pad = _round_up(max(n, 1), tile_rows * _LANES)
    x_fm = jnp.zeros((2, n_pad), dtype=jnp.float32)
    x_fm = x_fm.at[:, :n].set(x.T.astype(jnp.float32))
    return x_fm.reshape(2, n_pad // _LANES, _LANES)


def _choose_tile_rows(n, max_points_per_tile):
    rows_needed = max(1, _cdiv(max(n, 1), _LANES))
    max_rows = max(_SUBLANES, (max_points_per_tile // _LANES) // _SUBLANES * _SUBLANES)
    # Prefer >= 2 grid steps so the "parallel" batch axis shards across v7x's two TCs.
    half_rows = _round_up(_cdiv(rows_needed, 2), _SUBLANES)
    return max(_SUBLANES, min(max_rows, half_rows))


def physics_inn_forward_packed(params, x_packed, n, hidden, *, tile_rows, out_dtype):
    """Run the kernel on an already-packed (2, rows_total, 128) input."""
    rows_total = x_packed.shape[1]
    assert rows_total % tile_rows == 0
    grid = (rows_total // tile_rows,)
    n_pad = rows_total * _LANES

    cost = pl.CostEstimate(
        flops=6 * hidden * n_pad,            # 2 FMAs + bias + w2-mul + accumulate per unit
        transcendentals=hidden * n_pad,      # tanh
        bytes_accessed=4 * (2 * n_pad + n_pad) + 4 * (4 * hidden + 1),
    )

    out = pl.pallas_call(
        functools.partial(pinn_kernel, hidden=hidden),
        out_shape=jax.ShapeDtypeStruct((rows_total, _LANES), jnp.float32),
        grid_spec=pltpu.PrefetchScalarGridSpec(
            num_scalar_prefetch=0,
            grid=grid,
            in_specs=[
                # Tiny packed params live in SMEM and are read as scalars.
                pl.BlockSpec(memory_space=pltpu.MemorySpace.SMEM),
                # Feature-major batch tile, dense on (sublane, lane).
                pl.BlockSpec((2, tile_rows, _LANES), lambda i: (0, i, 0)),
            ],
            out_specs=pl.BlockSpec((tile_rows, _LANES), lambda i: (i, 0)),
        ),
        compiler_params=pltpu.CompilerParams(
            dimension_semantics=("parallel",),
        ),
        cost_estimate=cost,
    )(params, x_packed)

    return out.reshape(-1)[:n].reshape(n, 1).astype(out_dtype)


def physics_inn_forward(x, w1, b1, w2, b2, *, max_points_per_tile=4096):
    """Forward pass of PhysicsINN (num_layers=2).

    x : (N, 2) float32
    w1: (2, H), b1: (1, H) or (H,), w2: (H, 1), b2: (1, 1) or (1,)
    Returns (N, 1), identical to tanh(x @ w1 + b1) @ w2 + b2
    (== PyTorch's x @ W1.T + b1 ... with W stored (out, in)).
    """
    n = x.shape[0]
    hidden = w1.shape[1]
    assert x.shape[1] == 2

    tile_rows = _choose_tile_rows(n, max_points_per_tile)
    x_packed = pack_inputs(x, tile_rows)
    params = pack_params(w1, b1, w2, b2)
    return physics_inn_forward_packed(
        params, x_packed, n, hidden, tile_rows=tile_rows, out_dtype=x.dtype)


def init_params(key, num_neurons=20):
    """Xavier-normal weights, zero biases (matches PhysicsINN.init_weights)."""
    k1, k2 = jax.random.split(key)
    in_dim, out_dim = 2, 1

    def xavier_normal(k, fan_in, fan_out):
        std = math.sqrt(2.0 / (fan_in + fan_out))
        return std * jax.random.normal(k, (fan_in, fan_out), dtype=jnp.float32)

    w1 = xavier_normal(k1, in_dim, num_neurons)         # (2, H)  == PyTorch W1.T
    b1 = jnp.zeros((1, num_neurons), dtype=jnp.float32)
    w2 = xavier_normal(k2, num_neurons, out_dim)        # (H, 1)  == PyTorch W2.T
    b2 = jnp.zeros((1, out_dim), dtype=jnp.float32)
    return w1, b1, w2, b2


if __name__ == "__main__":
    key = jax.random.PRNGKey(0)
    k_x, k_p = jax.random.split(key)

    # Small shapes consistent with the module: batch=8, input features=2, hidden=20.
    N, num_neurons = 8, 20
    x = jax.random.normal(k_x, (N, 2), dtype=jnp.float32)
    w1, b1, w2, b2 = init_params(k_p, num_neurons)

    out = jax.block_until_ready(physics_inn_forward(x, w1, b1, w2, b2))
    ref = jnp.tanh(x @ w1 + b1) @ w2 + b2
    assert out.shape == (N, 1)
    assert jnp.allclose(out, ref, atol=1e-5, rtol=1e-5)

    # Also exercise the multi-step grid + ragged-batch padding path.
    N2 = 3000
    x2 = jax.random.normal(k_x, (N2, 2), dtype=jnp.float32)
    out2 = jax.block_until_ready(
        physics_inn_forward(x2, w1, b1, w2, b2, max_points_per_tile=1024))
    ref2 = jnp.tanh(x2 @ w1 + b1) @ w2 + b2
    assert out2.shape == (N2, 1)
    assert jnp.allclose(out2, ref2, atol=1e-5, rtol=1e-5)

    print("KERNEL_OK")
</pallas_src>

<mosaic_0001>
module attributes {stable_mosaic.version = 11 : i64} {
  func.func @pinn_kernel(%arg0: i32, %arg1: memref<81xf32, #tpu.memory_space<smem>>, %arg2: memref<2x8x128xf32, #tpu.memory_space<vmem>>, %arg3: memref<8x128xf32, #tpu.memory_space<vmem>>) attributes {dimension_semantics = [#tpu.dimension_semantics<parallel>], iteration_bounds = array<i64: 1>, scalar_prefetch = 0 : i64, scratch_operands = 0 : i64, tpu.core_type = #tpu.core_type<tc>, window_params = [{transform_indices = @transform_0, window_bounds = array<i64: 81>}, {transform_indices = @transform_1, window_bounds = array<i64: 2, 8, 128>}, {transform_indices = @transform_2, window_bounds = array<i64: 8, 128>}]} {
    %c0 = arith.constant 0 : index
    %c0_0 = arith.constant 0 : index
    %c0_1 = arith.constant 0 : index
    %0 = vector.load %arg2[%c0, %c0_0, %c0_1] : memref<2x8x128xf32, #tpu.memory_space<vmem>>, vector<1x8x128xf32>
    %1 = vector.shape_cast %0 : vector<1x8x128xf32> to vector<8x128xf32>
    %c1 = arith.constant 1 : index
    %c0_2 = arith.constant 0 : index
    %c0_3 = arith.constant 0 : index
    %2 = vector.load %arg2[%c1, %c0_2, %c0_3] : memref<2x8x128xf32, #tpu.memory_space<vmem>>, vector<1x8x128xf32>
    %3 = vector.shape_cast %2 : vector<1x8x128xf32> to vector<8x128xf32>
    %cst = arith.constant 0.000000e+00 : f32
    %4 = vector.broadcast %cst : f32 to vector<8x128xf32>
    %c0_4 = arith.constant 0 : index
    %5 = memref.load %arg1[%c0_4] : memref<81xf32, #tpu.memory_space<smem>>
    %c20 = arith.constant 20 : index
    %6 = memref.load %arg1[%c20] : memref<81xf32, #tpu.memory_space<smem>>
    %c40 = arith.constant 40 : index
    %7 = memref.load %arg1[%c40] : memref<81xf32, #tpu.memory_space<smem>>
    %c60 = arith.constant 60 : index
    %8 = memref.load %arg1[%c60] : memref<81xf32, #tpu.memory_space<smem>>
    %9 = vector.broadcast %5 : f32 to vector<8x128xf32>
    %10 = arith.mulf %9, %1 : vector<8x128xf32>
    %11 = vector.broadcast %6 : f32 to vector<8x128xf32>
    %12 = arith.mulf %11, %3 : vector<8x128xf32>
    %13 = arith.addf %10, %12 : vector<8x128xf32>
    %14 = vector.broadcast %7 : f32 to vector<8x128xf32>
    %15 = arith.addf %13, %14 : vector<8x128xf32>
    %16 = math.tanh %15 : vector<8x128xf32>
    %17 = vector.broadcast %8 : f32 to vector<8x128xf32>
    %18 = arith.mulf %17, %16 : vector<8x128xf32>
    %19 = arith.addf %4, %18 : vector<8x128xf32>
    %c1_5 = arith.constant 1 : index
    %20 = memref.load %arg1[%c1_5] : memref<81xf32, #tpu.memory_space<smem>>
    %c21 = arith.constant 21 : index
    %21 = memref.load %arg1[%c21] : memref<81xf32, #tpu.memory_space<smem>>
    %c41 = arith.constant 41 : index
    %22 = memref.load %arg1[%c41] : memref<81xf32, #tpu.memory_space<smem>>
    %c61 = arith.constant 61 : index
    %23 = memref.load %arg1[%c61] : memref<81xf32, #tpu.memory_space<smem>>
    %24 = vector.broadcast %20 : f32 to vector<8x128xf32>
    %25 = arith.mulf %24, %1 : vector<8x128xf32>
    %26 = vector.broadcast %21 : f32 to vector<8x128xf32>
    %27 = arith.mulf %26, %3 : vector<8x128xf32>
    %28 = arith.addf %25, %27 : vector<8x128xf32>
    %29 = vector.broadcast %22 : f32 to vector<8x128xf32>
    %30 = arith.addf %28, %29 : vector<8x128xf32>
    %31 = math.tanh %30 : vector<8x128xf32>
    %32 = vector.broadcast %23 : f32 to vector<8x128xf32>
    %33 = arith.mulf %32, %31 : vector<8x128xf32>
    %34 = arith.addf %19, %33 : vector<8x128xf32>
    %c2 = arith.constant 2 : index
    %35 = memref.load %arg1[%c2] : memref<81xf32, #tpu.memory_space<smem>>
    %c22 = arith.constant 22 : index
    %36 = memref.load %arg1[%c22] : memref<81xf32, #tpu.memory_space<smem>>
    %c42 = arith.constant 42 : index
    %37 = memref.load %arg1[%c42] : memref<81xf32, #tpu.memory_space<smem>>
    %c62 = arith.constant 62 : index
    %38 = memref.load %arg1[%c62] : memref<81xf32, #tpu.memory_space<smem>>
    %39 = vector.broadcast %35 : f32 to vector<8x128xf32>
    %40 = arith.mulf %39, %1 : vector<8x128xf32>
    %41 = vector.broadcast %36 : f32 to vector<8x128xf32>
    %42 = arith.mulf %41, %3 : vector<8x128xf32>
    %43 = arith.addf %40, %42 : vector<8x128xf32>
    %44 = vector.broadcast %37 : f32 to vector<8x128xf32>
    %45 = arith.addf %43, %44 : vector<8x128xf32>
    %46 = math.tanh %45 : vector<8x128xf32>
    %47 = vector.broadcast %38 : f32 to vector<8x128xf32>
    %48 = arith.mulf %47, %46 : vector<8x128xf32>
    %49 = arith.addf %34, %48 : vector<8x128xf32>
    %c3 = arith.constant 3 : index
    %50 = memref.load %arg1[%c3] : memref<81xf32, #tpu.memory_space<smem>>
    %c23 = arith.constant 23 : index
    %51 = memref.load %arg1[%c23] : memref<81xf32, #tpu.memory_space<smem>>
    %c43 = arith.constant 43 : index
    %52 = memref.load %arg1[%c43] : memref<81xf32, #tpu.memory_space<smem>>
    %c63 = arith.constant 63 : index
    %53 = memref.load %arg1[%c63] : memref<81xf32, #tpu.memory_space<smem>>
    %54 = vector.broadcast %50 : f32 to vector<8x128xf32>
    %55 = arith.mulf %54, %1 : vector<8x128xf32>
    %56 = vector.broadcast %51 : f32 to vector<8x128xf32>
    %57 = arith.mulf %56, %3 : vector<8x128xf32>
    %58 = arith.addf %55, %57 : vector<8x128xf32>
    %59 = vector.broadcast %52 : f32 to vector<8x128xf32>
    %60 = arith.addf %58, %59 : vector<8x128xf32>
    %61 = math.tanh %60 : vector<8x128xf32>
    %62 = vector.broadcast %53 : f32 to vector<8x128xf32>
    %63 = arith.mulf %62, %61 : vector<8x128xf32>
    %64 = arith.addf %49, %63 : vector<8x128xf32>
    %c4 = arith.constant 4 : index
    %65 = memref.load %arg1[%c4] : memref<81xf32, #tpu.memory_space<smem>>
    %c24 = arith.constant 24 : index
    %66 = memref.load %arg1[%c24] : memref<81xf32, #tpu.memory_space<smem>>
    %c44 = arith.constant 44 : index
    %67 = memref.load %arg1[%c44] : memref<81xf32, #tpu.memory_space<smem>>
    %c64 = arith.constant 64 : index
    %68 = memref.load %arg1[%c64] : memref<81xf32, #tpu.memory_space<smem>>
    %69 = vector.broadcast %65 : f32 to vector<8x128xf32>
    %70 = arith.mulf %69, %1 : vector<8x128xf32>
    %71 = vector.broadcast %66 : f32 to vector<8x128xf32>
    %72 = arith.mulf %71, %3 : vector<8x128xf32>
    %73 = arith.addf %70, %72 : vector<8x128xf32>
    %74 = vector.broadcast %67 : f32 to vector<8x128xf32>
    %75 = arith.addf %73, %74 : vector<8x128xf32>
    %76 = math.tanh %75 : vector<8x128xf32>
    %77 = vector.broadcast %68 : f32 to vector<8x128xf32>
    %78 = arith.mulf %77, %76 : vector<8x128xf32>
    %79 = arith.addf %64, %78 : vector<8x128xf32>
    %c5 = arith.constant 5 : index
    %80 = memref.load %arg1[%c5] : memref<81xf32, #tpu.memory_space<smem>>
    %c25 = arith.constant 25 : index
    %81 = memref.load %arg1[%c25] : memref<81xf32, #tpu.memory_space<smem>>
    %c45 = arith.constant 45 : index
    %82 = memref.load %arg1[%c45] : memref<81xf32, #tpu.memory_space<smem>>
    %c65 = arith.constant 65 : index
    %83 = memref.load %arg1[%c65] : memref<81xf32, #tpu.memory_space<smem>>
    %84 = vector.broadcast %80 : f32 to vector<8x128xf32>
    %85 = arith.mulf %84, %1 : vector<8x128xf32>
    %86 = vector.broadcast %81 : f32 to vector<8x128xf32>
    %87 = arith.mulf %86, %3 : vector<8x128xf32>
    %88 = arith.addf %85, %87 : vector<8x128xf32>
    %89 = vector.broadcast %82 : f32 to vector<8x128xf32>
    %90 = arith.addf %88, %89 : vector<8x128xf32>
    %91 = math.tanh %90 : vector<8x128xf32>
    %92 = vector.broadcast %83 : f32 to vector<8x128xf32>
    %93 = arith.mulf %92, %91 : vector<8x128xf32>
    %94 = arith.addf %79, %93 : vector<8x128xf32>
    %c6 = arith.constant 6 : index
    %95 = memref.load %arg1[%c6] : memref<81xf32, #tpu.memory_space<smem>>
    %c26 = arith.constant 26 : index
    %96 = memref.load %arg1[%c26] : memref<81xf32, #tpu.memory_space<smem>>
    %c46 = arith.constant 46 : index
    %97 = memref.load %arg1[%c46] : memref<81xf32, #tpu.memory_space<smem>>
    %c66 = arith.constant 66 : index
    %98 = memref.load %arg1[%c66] : memref<81xf32, #tpu.memory_space<smem>>
    %99 = vector.broadcast %95 : f32 to vector<8x128xf32>
    %100 = arith.mulf %99, %1 : vector<8x128xf32>
    %101 = vector.broadcast %96 : f32 to vector<8x128xf32>
    %102 = arith.mulf %101, %3 : vector<8x128xf32>
    %103 = arith.addf %100, %102 : vector<8x128xf32>
    %104 = vector.broadcast %97 : f32 to vector<8x128xf32>
    %105 = arith.addf %103, %104 : vector<8x128xf32>
    %106 = math.tanh %105 : vector<8x128xf32>
    %107 = vector.broadcast %98 : f32 to vector<8x128xf32>
    %108 = arith.mulf %107, %106 : vector<8x128xf32>
    %109 = arith.addf %94, %108 : vector<8x128xf32>
    %c7 = arith.constant 7 : index
    %110 = memref.load %arg1[%c7] : memref<81xf32, #tpu.memory_space<smem>>
    %c27 = arith.constant 27 : index
    %111 = memref.load %arg1[%c27] : memref<81xf32, #tpu.memory_space<smem>>
    %c47 = arith.constant 47 : index
    %112 = memref.load %arg1[%c47] : memref<81xf32, #tpu.memory_space<smem>>
    %c67 = arith.constant 67 : index
    %113 = memref.load %arg1[%c67] : memref<81xf32, #tpu.memory_space<smem>>
    %114 = vector.broadcast %110 : f32 to vector<8x128xf32>
    %115 = arith.mulf %114, %1 : vector<8x128xf32>
    %116 = vector.broadcast %111 : f32 to vector<8x128xf32>
    %117 = arith.mulf %116, %3 : vector<8x128xf32>
    %118 = arith.addf %115, %117 : vector<8x128xf32>
    %119 = vector.broadcast %112 : f32 to vector<8x128xf32>
    %120 = arith.addf %118, %119 : vector<8x128xf32>
    %121 = math.tanh %120 : vector<8x128xf32>
    %122 = vector.broadcast %113 : f32 to vector<8x128xf32>
    %123 = arith.mulf %122, %121 : vector<8x128xf32>
    %124 = arith.addf %109, %123 : vector<8x128xf32>
    %c8 = arith.constant 8 : index
    %125 = memref.load %arg1[%c8] : memref<81xf32, #tpu.memory_space<smem>>
    %c28 = arith.constant 28 : index
    %126 = memref.load %arg1[%c28] : memref<81xf32, #tpu.memory_space<smem>>
    %c48 = arith.constant 48 : index
    %127 = memref.load %arg1[%c48] : memref<81xf32, #tpu.memory_space<smem>>
    %c68 = arith.constant 68 : index
    %128 = memref.load %arg1[%c68] : memref<81xf32, #tpu.memory_space<smem>>
    %129 = vector.broadcast %125 : f32 to vector<8x128xf32>
    %130 = arith.mulf %129, %1 : vector<8x128xf32>
    %131 = vector.broadcast %126 : f32 to vector<8x128xf32>
    %132 = arith.mulf %131, %3 : vector<8x128xf32>
    %133 = arith.addf %130, %132 : vector<8x128xf32>
    %134 = vector.broadcast %127 : f32 to vector<8x128xf32>
    %135 = arith.addf %133, %134 : vector<8x128xf32>
    %136 = math.tanh %135 : vector<8x128xf32>
    %137 = vector.broadcast %128 : f32 to vector<8x128xf32>
    %138 = arith.mulf %137, %136 : vector<8x128xf32>
    %139 = arith.addf %124, %138 : vector<8x128xf32>
    %c9 = arith.constant 9 : index
    %140 = memref.load %arg1[%c9] : memref<81xf32, #tpu.memory_space<smem>>
    %c29 = arith.constant 29 : index
    %141 = memref.load %arg1[%c29] : memref<81xf32, #tpu.memory_space<smem>>
    %c49 = arith.constant 49 : index
    %142 = memref.load %arg1[%c49] : memref<81xf32, #tpu.memory_space<smem>>
    %c69 = arith.constant 69 : index
    %143 = memref.load %arg1[%c69] : memref<81xf32, #tpu.memory_space<smem>>
    %144 = vector.broadcast %140 : f32 to vector<8x128xf32>
    %145 = arith.mulf %144, %1 : vector<8x128xf32>
    %146 = vector.broadcast %141 : f32 to vector<8x128xf32>
    %147 = arith.mulf %146, %3 : vector<8x128xf32>
    %148 = arith.addf %145, %147 : vector<8x128xf32>
    %149 = vector.broadcast %142 : f32 to vector<8x128xf32>
    %150 = arith.addf %148, %149 : vector<8x128xf32>
    %151 = math.tanh %150 : vector<8x128xf32>
    %152 = vector.broadcast %143 : f32 to vector<8x128xf32>
    %153 = arith.mulf %152, %151 : vector<8x128xf32>
    %154 = arith.addf %139, %153 : vector<8x128xf32>
    %c10 = arith.constant 10 : index
    %155 = memref.load %arg1[%c10] : memref<81xf32, #tpu.memory_space<smem>>
    %c30 = arith.constant 30 : index
    %156 = memref.load %arg1[%c30] : memref<81xf32, #tpu.memory_space<smem>>
    %c50 = arith.constant 50 : index
    %157 = memref.load %arg1[%c50] : memref<81xf32, #tpu.memory_space<smem>>
    %c70 = arith.constant 70 : index
    %158 = memref.load %arg1[%c70] : memref<81xf32, #tpu.memory_space<smem>>
    %159 = vector.broadcast %155 : f32 to vector<8x128xf32>
    %160 = arith.mulf %159, %1 : vector<8x128xf32>
    %161 = vector.broadcast %156 : f32 to vector<8x128xf32>
    %162 = arith.mulf %161, %3 : vector<8x128xf32>
    %163 = arith.addf %160, %162 : vector<8x128xf32>
    %164 = vector.broadcast %157 : f32 to vector<8x128xf32>
    %165 = arith.addf %163, %164 : vector<8x128xf32>
    %166 = math.tanh %165 : vector<8x128xf32>
    %167 = vector.broadcast %158 : f32 to vector<8x128xf32>
    %168 = arith.mulf %167, %166 : vector<8x128xf32>
    %169 = arith.addf %154, %168 : vector<8x128xf32>
    %c11 = arith.constant 11 : index
    %170 = memref.load %arg1[%c11] : memref<81xf32, #tpu.memory_space<smem>>
    %c31 = arith.constant 31 : index
    %171 = memref.load %arg1[%c31] : memref<81xf32, #tpu.memory_space<smem>>
    %c51 = arith.constant 51 : index
    %172 = memref.load %arg1[%c51] : memref<81xf32, #tpu.memory_space<smem>>
    %c71 = arith.constant 71 : index
    %173 = memref.load %arg1[%c71] : memref<81xf32, #tpu.memory_space<smem>>
    %174 = vector.broadcast %170 : f32 to vector<8x128xf32>
    %175 = arith.mulf %174, %1 : vector<8x128xf32>
    %176 = vector.broadcast %171 : f32 to vector<8x128xf32>
    %177 = arith.mulf %176, %3 : vector<8x128xf32>
    %178 = arith.addf %175, %177 : vector<8x128xf32>
    %179 = vector.broadcast %172 : f32 to vector<8x128xf32>
    %180 = arith.addf %178, %179 : vector<8x128xf32>
    %181 = math.tanh %180 : vector<8x128xf32>
    %182 = vector.broadcast %173 : f32 to vector<8x128xf32>
    %183 = arith.mulf %182, %181 : vector<8x128xf32>
    %184 = arith.addf %169, %183 : vector<8x128xf32>
    %c12 = arith.constant 12 : index
    %185 = memref.load %arg1[%c12] : memref<81xf32, #tpu.memory_space<smem>>
    %c32 = arith.constant 32 : index
    %186 = memref.load %arg1[%c32] : memref<81xf32, #tpu.memory_space<smem>>
    %c52 = arith.constant 52 : index
    %187 = memref.load %arg1[%c52] : memref<81xf32, #tpu.memory_space<smem>>
    %c72 = arith.constant 72 : index
    %188 = memref.load %arg1[%c72] : memref<81xf32, #tpu.memory_space<smem>>
    %189 = vector.broadcast %185 : f32 to vector<8x128xf32>
    %190 = arith.mulf %189, %1 : vector<8x128xf32>
    %191 = vector.broadcast %186 : f32 to vector<8x128xf32>
    %192 = arith.mulf %191, %3 : vector<8x128xf32>
    %193 = arith.addf %190, %192 : vector<8x128xf32>
    %194 = vector.broadcast %187 : f32 to vector<8x128xf32>
    %195 = arith.addf %193, %194 : vector<8x128xf32>
    %196 = math.tanh %195 : vector<8x128xf32>
    %197 = vector.broadcast %188 : f32 to vector<8x128xf32>
    %198 = arith.mulf %197, %196 : vector<8x128xf32>
    %199 = arith.addf %184, %198 : vector<8x128xf32>
    %c13 = arith.constant 13 : index
    %200 = memref.load %arg1[%c13] : memref<81xf32, #tpu.memory_space<smem>>
    %c33 = arith.constant 33 : index
    %201 = memref.load %arg1[%c33] : memref<81xf32, #tpu.memory_space<smem>>
    %c53 = arith.constant 53 : index
    %202 = memref.load %arg1[%c53] : memref<81xf32, #tpu.memory_space<smem>>
    %c73 = arith.constant 73 : index
    %203 = memref.load %arg1[%c73] : memref<81xf32, #tpu.memory_space<smem>>
    %204 = vector.broadcast %200 : f32 to vector<8x128xf32>
    %205 = arith.mulf %204, %1 : vector<8x128xf32>
    %206 = vector.broadcast %201 : f32 to vector<8x128xf32>
    %207 = arith.mulf %206, %3 : vector<8x128xf32>
    %208 = arith.addf %205, %207 : vector<8x128xf32>
    %209 = vector.broadcast %202 : f32 to vector<8x128xf32>
    %210 = arith.addf %208, %209 : vector<8x128xf32>
    %211 = math.tanh %210 : vector<8x128xf32>
    %212 = vector.broadcast %203 : f32 to vector<8x128xf32>
    %213 = arith.mulf %212, %211 : vector<8x128xf32>
    %214 = arith.addf %199, %213 : vector<8x128xf32>
    %c14 = arith.constant 14 : index
    %215 = memref.load %arg1[%c14] : memref<81xf32, #tpu.memory_space<smem>>
    %c34 = arith.constant 34 : index
    %216 = memref.load %arg1[%c34] : memref<81xf32, #tpu.memory_space<smem>>
    %c54 = arith.constant 54 : index
    %217 = memref.load %arg1[%c54] : memref<81xf32, #tpu.memory_space<smem>>
    %c74 = arith.constant 74 : index
    %218 = memref.load %arg1[%c74] : memref<81xf32, #tpu.memory_space<smem>>
    %219 = vector.broadcast %215 : f32 to vector<8x128xf32>
    %220 = arith.mulf %219, %1 : vector<8x128xf32>
    %221 = vector.broadcast %216 : f32 to vector<8x128xf32>
    %222 = arith.mulf %221, %3 : vector<8x128xf32>
    %223 = arith.addf %220, %222 : vector<8x128xf32>
    %224 = vector.broadcast %217 : f32 to vector<8x128xf32>
    %225 = arith.addf %223, %224 : vector<8x128xf32>
    %226 = math.tanh %225 : vector<8x128xf32>
    %227 = vector.broadcast %218 : f32 to vector<8x128xf32>
    %228 = arith.mulf %227, %226 : vector<8x128xf32>
    %229 = arith.addf %214, %228 : vector<8x128xf32>
    %c15 = arith.constant 15 : index
    %230 = memref.load %arg1[%c15] : memref<81xf32, #tpu.memory_space<smem>>
    %c35 = arith.constant 35 : index
    %231 = memref.load %arg1[%c35] : memref<81xf32, #tpu.memory_space<smem>>
    %c55 = arith.constant 55 : index
    %232 = memref.load %arg1[%c55] : memref<81xf32, #tpu.memory_space<smem>>
    %c75 = arith.constant 75 : index
    %233 = memref.load %arg1[%c75] : memref<81xf32, #tpu.memory_space<smem>>
    %234 = vector.broadcast %230 : f32 to vector<8x128xf32>
    %235 = arith.mulf %234, %1 : vector<8x128xf32>
    %236 = vector.broadcast %231 : f32 to vector<8x128xf32>
    %237 = arith.mulf %236, %3 : vector<8x128xf32>
    %238 = arith.addf %235, %237 : vector<8x128xf32>
    %239 = vector.broadcast %232 : f32 to vector<8x128xf32>
    %240 = arith.addf %238, %239 : vector<8x128xf32>
    %241 = math.tanh %240 : vector<8x128xf32>
    %242 = vector.broadcast %233 : f32 to vector<8x128xf32>
    %243 = arith.mulf %242, %241 : vector<8x128xf32>
    %244 = arith.addf %229, %243 : vector<8x128xf32>
    %c16 = arith.constant 16 : index
    %245 = memref.load %arg1[%c16] : memref<81xf32, #tpu.memory_space<smem>>
    %c36 = arith.constant 36 : index
    %246 = memref.load %arg1[%c36] : memref<81xf32, #tpu.memory_space<smem>>
    %c56 = arith.constant 56 : index
    %247 = memref.load %arg1[%c56] : memref<81xf32, #tpu.memory_space<smem>>
    %c76 = arith.constant 76 : index
    %248 = memref.load %arg1[%c76] : memref<81xf32, #tpu.memory_space<smem>>
    %249 = vector.broadcast %245 : f32 to vector<8x128xf32>
    %250 = arith.mulf %249, %1 : vector<8x128xf32>
    %251 = vector.broadcast %246 : f32 to vector<8x128xf32>
    %252 = arith.mulf %251, %3 : vector<8x128xf32>
    %253 = arith.addf %250, %252 : vector<8x128xf32>
    %254 = vector.broadcast %247 : f32 to vector<8x128xf32>
    %255 = arith.addf %253, %254 : vector<8x128xf32>
    %256 = math.tanh %255 : vector<8x128xf32>
    %257 = vector.broadcast %248 : f32 to vector<8x128xf32>
    %258 = arith.mulf %257, %256 : vector<8x128xf32>
    %259 = arith.addf %244, %258 : vector<8x128xf32>
    %c17 = arith.constant 17 : index
    %260 = memref.load %arg1[%c17] : memref<81xf32, #tpu.memory_space<smem>>
    %c37 = arith.constant 37 : index
    %261 = memref.load %arg1[%c37] : memref<81xf32, #tpu.memory_space<smem>>
    %c57 = arith.constant 57 : index
    %262 = memref.load %arg1[%c57] : memref<81xf32, #tpu.memory_space<smem>>
    %c77 = arith.constant 77 : index
    %263 = memref.load %arg1[%c77] : memref<81xf32, #tpu.memory_space<smem>>
    %264 = vector.broadcast %260 : f32 to vector<8x128xf32>
    %265 = arith.mulf %264, %1 : vector<8x128xf32>
    %266 = vector.broadcast %261 : f32 to vector<8x128xf32>
    %267 = arith.mulf %266, %3 : vector<8x128xf32>
    %268 = arith.addf %265, %267 : vector<8x128xf32>
    %269 = vector.broadcast %262 : f32 to vector<8x128xf32>
    %270 = arith.addf %268, %269 : vector<8x128xf32>
    %271 = math.tanh %270 : vector<8x128xf32>
    %272 = vector.broadcast %263 : f32 to vector<8x128xf32>
    %273 = arith.mulf %272, %271 : vector<8x128xf32>
    %274 = arith.addf %259, %273 : vector<8x128xf32>
    %c18 = arith.constant 18 : index
    %275 = memref.load %arg1[%c18] : memref<81xf32, #tpu.memory_space<smem>>
    %c38 = arith.constant 38 : index
    %276 = memref.load %arg1[%c38] : memref<81xf32, #tpu.memory_space<smem>>
    %c58 = arith.constant 58 : index
    %277 = memref.load %arg1[%c58] : memref<81xf32, #tpu.memory_space<smem>>
    %c78 = arith.constant 78 : index
    %278 = memref.load %arg1[%c78] : memref<81xf32, #tpu.memory_space<smem>>
    %279 = vector.broadcast %275 : f32 to vector<8x128xf32>
    %280 = arith.mulf %279, %1 : vector<8x128xf32>
    %281 = vector.broadcast %276 : f32 to vector<8x128xf32>
    %282 = arith.mulf %281, %3 : vector<8x128xf32>
    %283 = arith.addf %280, %282 : vector<8x128xf32>
    %284 = vector.broadcast %277 : f32 to vector<8x128xf32>
    %285 = arith.addf %283, %284 : vector<8x128xf32>
    %286 = math.tanh %285 : vector<8x128xf32>
    %287 = vector.broadcast %278 : f32 to vector<8x128xf32>
    %288 = arith.mulf %287, %286 : vector<8x128xf32>
    %289 = arith.addf %274, %288 : vector<8x128xf32>
    %c19 = arith.constant 19 : index
    %290 = memref.load %arg1[%c19] : memref<81xf32, #tpu.memory_space<smem>>
    %c39 = arith.constant 39 : index
    %291 = memref.load %arg1[%c39] : memref<81xf32, #tpu.memory_space<smem>>
    %c59 = arith.constant 59 : index
    %292 = memref.load %arg1[%c59] : memref<81xf32, #tpu.memory_space<smem>>
    %c79 = arith.constant 79 : index
    %293 = memref.load %arg1[%c79] : memref<81xf32, #tpu.memory_space<smem>>
    %294 = vector.broadcast %290 : f32 to vector<8x128xf32>
    %295 = arith.mulf %294, %1 : vector<8x128xf32>
    %296 = vector.broadcast %291 : f32 to vector<8x128xf32>
    %297 = arith.mulf %296, %3 : vector<8x128xf32>
    %298 = arith.addf %295, %297 : vector<8x128xf32>
    %299 = vector.broadcast %292 : f32 to vector<8x128xf32>
    %300 = arith.addf %298, %299 : vector<8x128xf32>
    %301 = math.tanh %300 : vector<8x128xf32>
    %302 = vector.broadcast %293 : f32 to vector<8x128xf32>
    %303 = arith.mulf %302, %301 : vector<8x128xf32>
    %304 = arith.addf %289, %303 : vector<8x128xf32>
    %c80 = arith.constant 80 : index
    %305 = memref.load %arg1[%c80] : memref<81xf32, #tpu.memory_space<smem>>
    %306 = vector.broadcast %305 : f32 to vector<8x128xf32>
    %307 = arith.addf %304, %306 : vector<8x128xf32>
    %c0_6 = arith.constant 0 : index
    %c0_7 = arith.constant 0 : index
    %308 = vector.load %arg3[%c0_6, %c0_7] : memref<8x128xf32, #tpu.memory_space<vmem>>, vector<8x128xf32>
    tpu.vector_store %arg3[%c0_6, %c0_7], %307 {strides = array<i32>} : memref<8x128xf32, #tpu.memory_space<vmem>>, vector<8x128xf32>,
    return
  }
  func.func @transform_0(%arg0: i32) -> i32 {
    %c0_i32 = arith.constant 0 : i32
    %c0_i32_0 = arith.constant 0 : i32
    return %c0_i32 : i32
  }
  func.func @transform_1(%arg0: i32) -> (i32, i32, i32) {
    %c0_i32 = arith.constant 0 : i32
    %c0_i32_0 = arith.constant 0 : i32
    %c0_i32_1 = arith.constant 0 : i32
    return %c0_i32, %arg0, %c0_i32_0 : i32, i32, i32
  }
  func.func @transform_2(%arg0: i32) -> (i32, i32) {
    %c0_i32 = arith.constant 0 : i32
    %c0_i32_0 = arith.constant 0 : i32
    return %arg0, %c0_i32 : i32, i32
  }
}

</mosaic_0001>

<bundles_post_ra>
// kernel: tpu_custom_call.1
= control target key start
LH: loop header
LB: loop body
LE: loop exit
PB: predicated region body
PF: predicated region fallthrough
CT: control target
= control target key end

     0   :  { %7 = vsyncpa [#allocation5], 0  ;;  %s705_s0 = inlined_call_operand.hbm [shape: f32[81], index: 0, kind: input, shape index: {}]   ;;  %s706_s1 = inlined_call_operand.hbm [shape: f32[2,8,128], index: 1, kind: input, shape index: {}]   ;;  %s707_s2 = inlined_call_operand.hbm [shape: f32[8,128], index: 2, kind: output, shape index: {}]  }
   0x1   :  { %8 = vsyncpa [#allocation3], 0 }
   0x2   :  { %9 = vsyncpa [#allocation4], 0  ;;  %s539_s9 = smov [#allocation2]   ;;  %s540_s12 = smov [#allocation6]  }
   0x3   :  { %17 = dma.hbm_to_smem %s705_s0, 16, %s539_s9, [#allocation5]  }
   0x4   :  { %s23_s13 = sshll.u32 %s540_s12, 4  ;;  %s24_s13 = int_to_ptr.vmem [resolvable:$true] %s23_s13 }
   0x5   :  { %s501_s14 = scalar_lea.vmem %s24_s13, 256  ;;  %p506_p1 = scmp.lt.s32.totalorder %s24_s13, %s24_s13 }
   0x6   :  { %p502_p0 = scmp.ne.s32.totalorder %s24_s13, %s501_s14  ;;  %p507_p2 = scmp.lt.s32.totalorder %s501_s14, %s501_s14 }
   0x8   :  { %p508_p3 = por %p507_p2, %p506_p1 }
   0xa   :  { %p509_p4 = pnand %p508_p3, %p502_p0 }
   0xc   :  { %512 = shalt.err (!%p509_p4)
}
   0xd   :  { %s541_s15 = smov 128   ;;  %s542_s16 = smov 8  }
   0xe   :  { %29 = dma.hbm_to_vmem [thread:$0]  %s706_s1, 256, %s24_s13, [#allocation3], %s541_s15, %s541_s15, %s542_s16  }
   0xf   :  { %533 = dma.done.wait [#allocation5], 16  }
  0x10   :  { %534 = vsyncadd [#allocation5], 4294967280 }
  0x11   :  { %535 = dma.done.wait [#allocation3], 256  }
  0x12   :  { %536 = vsyncadd [#allocation3], 4294967040 }
  0x13   :  { %36 = sfence }
  0x14   :  { %s40_s0 = sld [smem:[#allocation2]]  ;;  %v565_v0 = vld [vmem:[#allocation6] sm:$0xff]  ;;  %v567_v1 = vld [vmem:[#allocation6 + $0x8] sm:$0xff] }
  0x15   :  { %s360_s19 = sld [smem:[#allocation2 + $0x14]] }
  0x16   :  { %s361_s20 = sld [smem:[#allocation2 + $0x28]] }
  0x17   :  { %s363_s21 = sld [smem:[#allocation2 + $0x1]] }
  0x18   :  { %s364_s22 = sld [smem:[#allocation2 + $0x15]] }
  0x19   :  { %s365_s23 = sld [smem:[#allocation2 + $0x29]] }
  0x1a   :  { %v44_v2 = vstv %s40_s0  ;;  %s367_s1 = sld [smem:[#allocation2 + $0x2]] }
  0x1b   :  { %v45_v3 = vmul.f32 %v44_v2, %v565_v0  ;;  %v46_v4 = vstv %s360_s19  ;;  %s368_s24 = sld [smem:[#allocation2 + $0x16]] }
  0x1c   :  { %v47_v5 = vmul.f32 %v46_v4, %v567_v1  ;;  %v49_v6 = vstv %s361_s20  ;;  %s369_s25 = sld [smem:[#allocation2 + $0x2a]] }
  0x1d   :  { %v59_v8 = vstv %s363_s21  ;;  %s371_s26 = sld [smem:[#allocation2 + $0x3]] }
  0x1e   :  { %v48_v7 = vadd.f32 %v47_v5, %v45_v3  ;;  %v60_v9 = vmul.f32 %v59_v8, %v565_v0  ;;  %v61_v10 = vstv %s364_s22  ;;  %s372_s27 = sld [smem:[#allocation2 + $0x17]] }
  0x1f   :  { %v62_v12 = vmul.f32 %v61_v10, %v567_v1  ;;  %v64_v13 = vstv %s365_s23  ;;  %s373_s28 = sld [smem:[#allocation2 + $0x2b]] }
  0x20   :  { %v50_v11 = vadd.f32 %v49_v6, %v48_v7  ;;  %v74_v15 = vstv %s367_s1  ;;  %s573_s29 = sld [smem:[#allocation2 + $0x3c]] }
  0x21   :  { %v63_v14 = vadd.f32 %v62_v12, %v60_v9  ;;  %v75_v16 = vmul.f32 %v74_v15, %v565_v0  ;;  %v76_v17 = vstv %s368_s24  ;;  %s375_s30 = sld [smem:[#allocation2 + $0x4]] }
  0x22   :  { %445 = vtanh.f32 %v50_v11  ;;  %v77_v19 = vmul.f32 %v76_v17, %v567_v1  ;;  %v79_v20 = vstv %s369_s25  ;;  %s376_s3 = sld [smem:[#allocation2 + $0x18]] }
  0x23   :  { %v65_v18 = vadd.f32 %v64_v13, %v63_v14  ;;  %v89_v22 = vstv %s371_s26  ;;  %s577_s4 = sld [smem:[#allocation2 + $0x2c]] }
  0x24   :  { %v78_v21 = vadd.f32 %v77_v19, %v75_v16  ;;  %s579_s5 = sld [smem:[#allocation2 + $0x3d]]  ;;  %v90_v23 = vmul.f32 %v89_v22, %v565_v0  ;;  %v91_v24 = vstv %s372_s27 }
  0x25   :  { %447 = vtanh.f32 %v65_v18  ;;  %v92_v26 = vmul.f32 %v91_v24, %v567_v1  ;;  %s379_s6 = sld [smem:[#allocation2 + $0x5]]  ;;  %v94_v27 = vstv %s373_s28 }
  0x26   :  { %v80_v25 = vadd.f32 %v79_v20, %v78_v21  ;;  %s380_s7 = sld [smem:[#allocation2 + $0x19]]  ;;  %v52_v38 = vstv %s573_s29 }
  0x27   :  { %v93_v28 = vadd.f32 %v92_v26, %v90_v23  ;;  %v104_v29 = vstv %s375_s30  ;;  %s583_s8 = sld [smem:[#allocation2 + $0x2d]] }
  0x28   :  { %449 = vtanh.f32 %v80_v25  ;;  %s585_s9 = sld [smem:[#allocation2 + $0x3e]]  ;;  %v105_v30 = vmul.f32 %v104_v29, %v565_v0  ;;  %v106_v31 = vstv %s376_s3 }
  0x29   :  { %v95_v32 = vadd.f32 %v94_v27, %v93_v28  ;;  %v107_v33 = vmul.f32 %v106_v31, %v567_v1  ;;  %s383_s10 = sld [smem:[#allocation2 + $0x6]]  ;;  %v109_v34 = vstv %s577_s4 }
  0x2a   :  { %s384_s11 = sld [smem:[#allocation2 + $0x1a]]  ;;  %v67_v43 = vstv %s579_s5 }
  0x2b   :  { %451 = vtanh.f32 %v95_v32  ;;  %v108_v35 = vadd.f32 %v107_v33, %v105_v30  ;;  %v119_v36 = vstv %s379_s6  ;;  %s590_s12 = sld [smem:[#allocation2 + $0x2e]] }
  0x2c   :  { %s593_s13 = sld [smem:[#allocation2 + $0x3f]]  ;;  %v120_v39 = vmul.f32 %v119_v36, %v565_v0  ;;  %v121_v40 = vstv %s380_s7 }
  0x2d   :  { %v110_v41 = vadd.f32 %v109_v34, %v108_v35  ;;  %v122_v42 = vmul.f32 %v121_v40, %v567_v1  ;;  %s387_s14 = sld [smem:[#allocation2 + $0x7]]  ;;  %v124_v44 = vstv %s583_s8 }
  0x2e   :  { %s388_s15 = sld [smem:[#allocation2 + $0x1b]]  ;;  %v82_v54 = vstv %s585_s9 }
  0x2f   :  { %v446_v37 = vpop.eup %445  ;;  %453 = vtanh.f32 %v110_v41  ;;  %v123_v46 = vadd.f32 %v122_v42, %v120_v39  ;;  %v134_v47 = vstv %s383_s10  ;;  %s599_s16 = sld [smem:[#allocation2 + $0x2f]] }
  0x30   :  { %v53_v45 = vmul.f32 %v446_v37, %v52_v38  ;;  %s601_s17 = sld [smem:[#allocation2 + $0x40]]  ;;  %v135_v49 = vmul.f32 %v134_v47, %v565_v0  ;;  %v136_v50 = vstv %s384_s11 }
  0x31   :  { %v125_v52 = vadd.f32 %v124_v44, %v123_v46  ;;  %v137_v53 = vmul.f32 %v136_v50, %v567_v1  ;;  %s391_s18 = sld [smem:[#allocation2 + $0x8]]  ;;  %v139_v55 = vstv %s590_s12 }
  0x32   :  { %v448_v48 = vpop.eup %447  ;;  %s392_s0 = sld [smem:[#allocation2 + $0x1c]]  ;;  %v97_v3 = vstv %s593_s13 }
  0x33   :  { %v68_v51 = vmul.f32 %v448_v48, %v67_v43  ;;  %455 = vtanh.f32 %v125_v52  ;;  %v138_v57 = vadd.f32 %v137_v53, %v135_v49  ;;  %v149_v58 = vstv %s387_s14  ;;  %s607_s19 = sld [smem:[#allocation2 + $0x30]] }
  0x34   :  { %s609_s20 = sld [smem:[#allocation2 + $0x41]]  ;;  %v150_v60 = vmul.f32 %v149_v58, %v565_v0  ;;  %v151_v61 = vstv %s388_s15 }
  0x35   :  { %v69_v56 = vadd.f32 %v68_v51, %v53_v45  ;;  %v450_v59 = vpop.eup %449  ;;  %v140_v63 = vadd.f32 %v139_v55, %v138_v57  ;;  %v152_v2 = vmul.f32 %v151_v61, %v567_v1  ;;  %s395_s21 = sld [smem:[#allocation2 + $0x9]]  ;;  %v154_v4 = vstv %s599_s16 }
  0x36   :  { %v83_v62 = vmul.f32 %v450_v59, %v82_v54  ;;  %s396_s22 = sld [smem:[#allocation2 + $0x1d]]  ;;  %v112_v14 = vstv %s601_s17 }
  0x37   :  { %457 = vtanh.f32 %v140_v63  ;;  %v153_v6 = vadd.f32 %v152_v2, %v150_v60  ;;  %v164_v7 = vstv %s391_s18  ;;  %s615_s23 = sld [smem:[#allocation2 + $0x31]] }
  0x38   :  { %v84_v5 = vadd.f32 %v83_v62, %v69_v56  ;;  %v452_v8 = vpop.eup %451  ;;  %s617_s1 = sld [smem:[#allocation2 + $0x42]]  ;;  %v165_v9 = vmul.f32 %v164_v7, %v565_v0  ;;  %v166_v10 = vstv %s392_s0 }
  0x39   :  { %v98_v11 = vmul.f32 %v452_v8, %v97_v3  ;;  %v155_v12 = vadd.f32 %v154_v4, %v153_v6  ;;  %v167_v13 = vmul.f32 %v166_v10, %v567_v1  ;;  %s399_s24 = sld [smem:[#allocation2 + $0xa]]  ;;  %v169_v15 = vstv %s607_s19 }
  0x3a   :  { %s400_s25 = sld [smem:[#allocation2 + $0x1e]]  ;;  %v127_v25 = vstv %s609_s20 }
  0x3b   :  { %v99_v16 = vadd.f32 %v98_v11, %v84_v5  ;;  %459 = vtanh.f32 %v155_v12  ;;  %v168_v17 = vadd.f32 %v167_v13, %v165_v9  ;;  %v179_v18 = vstv %s395_s21  ;;  %s623_s26 = sld [smem:[#allocation2 + $0x32]] }
  0x3c   :  { %v454_v19 = vpop.eup %453  ;;  %s625_s27 = sld [smem:[#allocation2 + $0x43]]  ;;  %v180_v20 = vmul.f32 %v179_v18, %v565_v0  ;;  %v181_v21 = vstv %s396_s22 }
  0x3d   :  { %v113_v22 = vmul.f32 %v454_v19, %v112_v14  ;;  %v170_v23 = vadd.f32 %v169_v15, %v168_v17  ;;  %v182_v24 = vmul.f32 %v181_v21, %v567_v1  ;;  %s403_s28 = sld [smem:[#allocation2 + $0xb]]  ;;  %v184_v26 = vstv %s615_s23 }
  0x3e   :  { %s404_s29 = sld [smem:[#allocation2 + $0x1f]]  ;;  %v142_v36 = vstv %s617_s1 }
  0x3f   :  { %v114_v27 = vadd.f32 %v113_v22, %v99_v16  ;;  %461 = vtanh.f32 %v170_v23  ;;  %v183_v28 = vadd.f32 %v182_v24, %v180_v20  ;;  %v194_v29 = vstv %s399_s24  ;;  %s631_s30 = sld [smem:[#allocation2 + $0x33]] }
  0x40   :  { %v456_v30 = vpop.eup %455  ;;  %s633_s3 = sld [smem:[#allocation2 + $0x44]]  ;;  %v195_v31 = vmul.f32 %v194_v29, %v565_v0  ;;  %v196_v32 = vstv %s400_s25 }
  0x41   :  { %v128_v33 = vmul.f32 %v456_v30, %v127_v25  ;;  %v185_v34 = vadd.f32 %v184_v26, %v183_v28  ;;  %v197_v35 = vmul.f32 %v196_v32, %v567_v1  ;;  %s407_s4 = sld [smem:[#allocation2 + $0xc]]  ;;  %v199_v37 = vstv %s623_s26 }
  0x42   :  { %s408_s5 = sld [smem:[#allocation2 + $0x20]]  ;;  %v157_v47 = vstv %s625_s27 }
  0x43   :  { %v129_v38 = vadd.f32 %v128_v33, %v114_v27  ;;  %463 = vtanh.f32 %v185_v34  ;;  %v198_v39 = vadd.f32 %v197_v35, %v195_v31  ;;  %v209_v40 = vstv %s403_s28  ;;  %s639_s6 = sld [smem:[#allocation2 + $0x34]] }
  0x44   :  { %v458_v41 = vpop.eup %457  ;;  %s641_s7 = sld [smem:[#allocation2 + $0x45]]  ;;  %v210_v42 = vmul.f32 %v209_v40, %v565_v0  ;;  %v211_v43 = vstv %s404_s29 }
  0x45   :  { %v143_v44 = vmul.f32 %v458_v41, %v142_v36  ;;  %v200_v45 = vadd.f32 %v199_v37, %v198_v39  ;;  %v212_v46 = vmul.f32 %v211_v43, %v567_v1  ;;  %s411_s8 = sld [smem:[#allocation2 + $0xd]]  ;;  %v214_v48 = vstv %s631_s30 }
  0x46   :  { %s412_s9 = sld [smem:[#allocation2 + $0x21]]  ;;  %v172_v58 = vstv %s633_s3 }
  0x47   :  { %v144_v49 = vadd.f32 %v143_v44, %v129_v38  ;;  %465 = vtanh.f32 %v200_v45  ;;  %v213_v50 = vadd.f32 %v212_v46, %v210_v42  ;;  %v224_v51 = vstv %s407_s4  ;;  %s647_s10 = sld [smem:[#allocation2 + $0x35]] }
  0x48   :  { %v460_v52 = vpop.eup %459  ;;  %s649_s11 = sld [smem:[#allocation2 + $0x46]]  ;;  %v225_v53 = vmul.f32 %v224_v51, %v565_v0  ;;  %v226_v54 = vstv %s408_s5 }
  0x49   :  { %v158_v55 = vmul.f32 %v460_v52, %v157_v47  ;;  %v215_v56 = vadd.f32 %v214_v48, %v213_v50  ;;  %v227_v57 = vmul.f32 %v226_v54, %v567_v1  ;;  %s415_s12 = sld [smem:[#allocation2 + $0xe]]  ;;  %v229_v59 = vstv %s639_s6 }
  0x4a   :  { %s416_s13 = sld [smem:[#allocation2 + $0x22]]  ;;  %v187_v7 = vstv %s641_s7 }
  0x4b   :  { %v159_v60 = vadd.f32 %v158_v55, %v144_v49  ;;  %467 = vtanh.f32 %v215_v56  ;;  %v228_v61 = vadd.f32 %v227_v57, %v225_v53  ;;  %v239_v62 = vstv %s411_s8  ;;  %s655_s14 = sld [smem:[#allocation2 + $0x36]] }
  0x4c   :  { %v462_v63 = vpop.eup %461  ;;  %s657_s15 = sld [smem:[#allocation2 + $0x47]]  ;;  %v240_v2 = vmul.f32 %v239_v62, %v565_v0  ;;  %v241_v3 = vstv %s412_s9 }
  0x4d   :  { %v173_v4 = vmul.f32 %v462_v63, %v172_v58  ;;  %v230_v5 = vadd.f32 %v229_v59, %v228_v61  ;;  %v242_v6 = vmul.f32 %v241_v3, %v567_v1  ;;  %s419_s16 = sld [smem:[#allocation2 + $0xf]]  ;;  %v244_v8 = vstv %s647_s10  ;;  %s543_s10 = smov [#allocation7]  }
  0x4e   :  { %s420_s17 = sld [smem:[#allocation2 + $0x23]]  ;;  %v202_v18 = vstv %s649_s11  ;;  %s350_s11 = sshll.u32 %s543_s10, 4  ;;  %s351_s11 = int_to_ptr.vmem [resolvable:$true] %s350_s11 }
  0x4f   :  { %v174_v9 = vadd.f32 %v173_v4, %v159_v60  ;;  %469 = vtanh.f32 %v230_v5  ;;  %v243_v10 = vadd.f32 %v242_v6, %v240_v2  ;;  %v254_v11 = vstv %s415_s12  ;;  %s663_s18 = sld [smem:[#allocation2 + $0x37]]  ;;  %s513_s12 = scalar_lea.vmem %s351_s11, 128 }
  0x50   :  { %v464_v12 = vpop.eup %463  ;;  %s665_s0 = sld [smem:[#allocation2 + $0x48]]  ;;  %v255_v13 = vmul.f32 %v254_v11, %v565_v0  ;;  %v256_v14 = vstv %s416_s13  ;;  %p514_p5 = scmp.ne.s32.totalorder %s351_s11, %s513_s12 }
  0x51   :  { %v188_v15 = vmul.f32 %v464_v12, %v187_v7  ;;  %v245_v16 = vadd.f32 %v244_v8, %v243_v10  ;;  %v257_v17 = vmul.f32 %v256_v14, %v567_v1  ;;  %s423_s19 = sld [smem:[#allocation2 + $0x10]]  ;;  %v259_v19 = vstv %s655_s14  ;;  %p518_p6 = scmp.lt.s32.totalorder %s351_s11, %s351_s11 }
  0x52   :  { %s424_s20 = sld [smem:[#allocation2 + $0x24]]  ;;  %v217_v29 = vstv %s657_s15  ;;  %p519_p7 = scmp.lt.s32.totalorder %s513_s12, %s513_s12 }
  0x53   :  { %v189_v20 = vadd.f32 %v188_v15, %v174_v9  ;;  %471 = vtanh.f32 %v245_v16  ;;  %v258_v21 = vadd.f32 %v257_v17, %v255_v13  ;;  %v269_v22 = vstv %s419_s16  ;;  %s671_s21 = sld [smem:[#allocation2 + $0x38]] }
  0x54   :  { %v466_v23 = vpop.eup %465  ;;  %s673_s22 = sld [smem:[#allocation2 + $0x49]]  ;;  %v270_v24 = vmul.f32 %v269_v22, %v565_v0  ;;  %v271_v25 = vstv %s420_s17  ;;  %p520_p8 = por %p519_p7, %p518_p6 }
  0x55   :  { %v203_v26 = vmul.f32 %v466_v23, %v202_v18  ;;  %v260_v27 = vadd.f32 %v259_v19, %v258_v21  ;;  %v272_v28 = vmul.f32 %v271_v25, %v567_v1  ;;  %s427_s23 = sld [smem:[#allocation2 + $0x11]]  ;;  %v274_v30 = vstv %s663_s18 }
  0x56   :  { %s428_s1 = sld [smem:[#allocation2 + $0x25]]  ;;  %v232_v40 = vstv %s665_s0  ;;  %p521_p9 = pnand %p520_p8, %p514_p5 }
  0x57   :  { %v204_v31 = vadd.f32 %v203_v26, %v189_v20  ;;  %473 = vtanh.f32 %v260_v27  ;;  %v273_v32 = vadd.f32 %v272_v28, %v270_v24  ;;  %v284_v33 = vstv %s423_s19  ;;  %s679_s24 = sld [smem:[#allocation2 + $0x39]] }
  0x58   :  { %v468_v34 = vpop.eup %467  ;;  %s681_s25 = sld [smem:[#allocation2 + $0x4a]]  ;;  %v285_v35 = vmul.f32 %v284_v33, %v565_v0  ;;  %v286_v36 = vstv %s424_s20 }
  0x59   :  { %v218_v37 = vmul.f32 %v468_v34, %v217_v29  ;;  %v275_v38 = vadd.f32 %v274_v30, %v273_v32  ;;  %v287_v39 = vmul.f32 %v286_v36, %v567_v1  ;;  %s431_s26 = sld [smem:[#allocation2 + $0x12]]  ;;  %v289_v41 = vstv %s671_s21 }
  0x5a   :  { %s432_s27 = sld [smem:[#allocation2 + $0x26]]  ;;  %v247_v51 = vstv %s673_s22 }
  0x5b   :  { %v219_v42 = vadd.f32 %v218_v37, %v204_v31  ;;  %475 = vtanh.f32 %v275_v38  ;;  %v288_v43 = vadd.f32 %v287_v39, %v285_v35  ;;  %v299_v44 = vstv %s427_s23  ;;  %s687_s28 = sld [smem:[#allocation2 + $0x3a]] }
  0x5c   :  { %v470_v45 = vpop.eup %469  ;;  %s689_s29 = sld [smem:[#allocation2 + $0x4b]]  ;;  %v300_v46 = vmul.f32 %v299_v44, %v565_v0  ;;  %v301_v47 = vstv %s428_s1 }
  0x5d   :  { %v233_v48 = vmul.f32 %v470_v45, %v232_v40  ;;  %v290_v49 = vadd.f32 %v289_v41, %v288_v43  ;;  %v302_v50 = vmul.f32 %v301_v47, %v567_v1  ;;  %s435_s30 = sld [smem:[#allocation2 + $0x13]]  ;;  %v304_v52 = vstv %s679_s24 }
  0x5e   :  { %s436_s3 = sld [smem:[#allocation2 + $0x27]]  ;;  %v262_v62 = vstv %s681_s25 }
  0x5f   :  { %v234_v53 = vadd.f32 %v233_v48, %v219_v42  ;;  %477 = vtanh.f32 %v290_v49  ;;  %v303_v54 = vadd.f32 %v302_v50, %v300_v46  ;;  %v314_v55 = vstv %s431_s26  ;;  %s437_s4 = sld [smem:[#allocation2 + $0x3b]] }
  0x60   :  { %v472_v56 = vpop.eup %471  ;;  %v315_v57 = vmul.f32 %v314_v55, %v565_v0  ;;  %v316_v58 = vstv %s432_s27  ;;  %s426_s5 = sld [smem:[#allocation2 + $0x4c]] }
  0x61   :  { %v248_v59 = vmul.f32 %v472_v56, %v247_v51  ;;  %v305_v60 = vadd.f32 %v304_v52, %v303_v54  ;;  %v317_v61 = vmul.f32 %v316_v58, %v567_v1  ;;  %v319_v63 = vstv %s687_s28  ;;  %s430_s6 = sld [smem:[#allocation2 + $0x4d]] }
  0x62   :  { %v277_v11 = vstv %s689_s29  ;;  %s434_s7 = sld [smem:[#allocation2 + $0x4e]] }
  0x63   :  { %v249_v2 = vadd.f32 %v248_v59, %v234_v53  ;;  %479 = vtanh.f32 %v305_v60  ;;  %v318_v3 = vadd.f32 %v317_v61, %v315_v57  ;;  %v329_v4 = vstv %s435_s30  ;;  %s438_s8 = sld [smem:[#allocation2 + $0x4f]] }
  0x64   :  { %v474_v5 = vpop.eup %473  ;;  %v330_v6 = vmul.f32 %v329_v4, %v565_v0  ;;  %v331_v7 = vstv %s436_s3  ;;  %s439_s9 = sld [smem:[#allocation2 + $0x50]] }
  0x65   :  { %v263_v8 = vmul.f32 %v474_v5, %v262_v62  ;;  %v320_v9 = vadd.f32 %v319_v63, %v318_v3  ;;  %v332_v10 = vmul.f32 %v331_v7, %v567_v1  ;;  %v334_v12 = vstv %s437_s4 }
  0x66   :  { %v292_v18 = vstv %s426_s5 }
  0x67   :  { %v264_v13 = vadd.f32 %v263_v8, %v249_v2  ;;  %481 = vtanh.f32 %v320_v9  ;;  %v333_v14 = vadd.f32 %v332_v10, %v330_v6  ;;  %v307_v21 = vstv %s430_s6 }
  0x68   :  { %v476_v15 = vpop.eup %475  ;;  %v322_v24 = vstv %s434_s7 }
  0x69   :  { %v278_v16 = vmul.f32 %v476_v15, %v277_v11  ;;  %v335_v17 = vadd.f32 %v334_v12, %v333_v14  ;;  %v337_v28 = vstv %s438_s8 }
  0x6a   :  { %v341_v32 = vstv %s439_s9 }
  0x6b   :  { %v279_v19 = vadd.f32 %v278_v16, %v264_v13  ;;  %483 = vtanh.f32 %v335_v17 }
  0x6c   :  { %v478_v20 = vpop.eup %477 }
  0x6d   :  { %v293_v0 = vmul.f32 %v478_v20, %v292_v18 }
  0x6f   :  { %v294_v22 = vadd.f32 %v293_v0, %v279_v19 }
  0x70   :  { %v480_v23 = vpop.eup %479 }
  0x71   :  { %v308_v1 = vmul.f32 %v480_v23, %v307_v21 }
  0x73   :  { %v309_v25 = vadd.f32 %v308_v1, %v294_v22 }
  0x74   :  { %v482_v26 = vpop.eup %481 }
  0x75   :  { %v323_v27 = vmul.f32 %v482_v26, %v322_v24 }
  0x77   :  { %v324_v29 = vadd.f32 %v323_v27, %v309_v25 }
  0x78   :  { %v484_v30 = vpop.eup %483 }
  0x79   :  { %v338_v31 = vmul.f32 %v484_v30, %v337_v28 }
  0x7b   :  { %v339_v33 = vadd.f32 %v338_v31, %v324_v29 }
  0x7d   :  { %v342_v34 = vadd.f32 %v341_v32, %v339_v33 }
  0x7f   :  { %343 = vst [vmem:[#allocation7] sm:$0xff] %v342_v34 }
  0x80   :  { %524 = shalt.err (!%p521_p9)
}
  0x81   :  { %353 = dma.vmem_to_hbm [thread:$0]  %s351_s11, 128, %s707_s2, [#allocation4]  }
  0x82   :  { %537 = dma.done.wait [#allocation4], 128  }
  0x83   :  { %538 = vsyncadd [#allocation4], 4294967168 }
  0x84   :  { %357 = vsyncpa [#allocation3], 1 }
  0x85   :  { %358 = vsyncpa [#allocation4], 1 }
  0x86   :  { %359 = vsyncpa [#allocation5], 1 }

</bundles_post_ra>
